<compile_context>
chip_gen: v6e
topology: v6e:2x2x1
jax: 0.10.0
libtpu: 0.0.40
codegen_flags: <defaults>
</compile_context>

<pallas_src>
import jax
import jax.numpy as jnp
from jax import lax
from jax.experimental import pallas as pl
from jax.experimental.pallas import tpu as pltpu

NUM_ACTIONS = 5
HIDDEN = 256
IN_FEATURES = 21
IN_PAD = 32          # pad 21 -> 32 features (zero rows in w1)
HEAD_PAD = 128       # lane-dense fused head width
SUBLANES = 8         # sublane alignment for the per-tile column-sum output


def _round_up(x, m):
    return (x + m - 1) // m * m


def _make_kernel(batch, tile_b, n_tiles):
    """Kernel closes over static batch size, tile size and tile count."""
    pad_rows = n_tiles * tile_b - batch  # static

    def kernel(x_ref,
               w1_ref, b1_ref, w2_ref, b2_ref, w3_ref, b3_ref, w4_ref, b4_ref,
               wh_ref, bh_ref,
               q_ref,            # (tile_b, 128) f32 output block (per tile)
               psum_ref):        # (1, 8, 128)   f32 per-tile A column sums
        # Encoder: 4 x (Linear + ReLU). bf16 operands, f32 accumulation.
        h = x_ref[...]                                   # (tile_b, 32) bf16
        for w_ref, b_ref in ((w1_ref, b1_ref), (w2_ref, b2_ref),
                             (w3_ref, b3_ref), (w4_ref, b4_ref)):
            z = jnp.dot(h, w_ref[...],
                        preferred_element_type=jnp.float32) + b_ref[...]
            h = jnp.maximum(z, 0.0).astype(jnp.bfloat16)

        # Fused dueling head: one lane-dense (256, 128) matmul.
        #   va[:, 0:5]  = V + A_j       (Q before the -mean(A) correction)
        #   va[:, 8:13] = A_j           (used only for the global mean)
        va = jnp.dot(h, wh_ref[...],
                     preferred_element_type=jnp.float32) + bh_ref[...]

        # Per-tile output block: writeback of tile i-1 overlaps compute of i.
        q_ref[...] = va

        def write_colsum(colsum):
            # Broadcast the (1, 128) column sums across 8 sublanes so the
            # psum output block stays (8, 128)-aligned; wrapper reads row 0.
            psum_ref[0] = jnp.broadcast_to(colsum, (SUBLANES, HEAD_PAD))

        def masked_colsum(i):
            # Padded batch rows (only possible in the last tile) must not
            # contribute to the global A-mean.
            row = i * tile_b + lax.broadcasted_iota(
                jnp.int32, (tile_b, HEAD_PAD), 0)
            return jnp.sum(jnp.where(row < batch, va, 0.0),
                           axis=0, keepdims=True)

        if pad_rows == 0:
            # No padded rows anywhere: plain column sum every tile.
            write_colsum(jnp.sum(va, axis=0, keepdims=True))
        elif n_tiles == 1:
            write_colsum(masked_colsum(0))
        else:
            i = pl.program_id(0)

            @pl.when(i < n_tiles - 1)
            def _full_tiles():
                write_colsum(jnp.sum(va, axis=0, keepdims=True))

            @pl.when(i == n_tiles - 1)
            def _last_tile():
                write_colsum(masked_colsum(i))

    return kernel


def pack_params(params):
    """Pad / fuse PyTorch-layout params into the kernel layout (bf16 weights)."""
    w1 = jnp.zeros((IN_PAD, HIDDEN), jnp.float32).at[:IN_FEATURES].set(params["w1"])

    wv, bv = params["wv"], params["bv"]          # (256,1), (1,1)
    wa, ba = params["wa"], params["ba"]          # (256,5), (1,5)
    wh = jnp.zeros((HIDDEN, HEAD_PAD), jnp.float32)
    wh = wh.at[:, 0:NUM_ACTIONS].set(wa + wv)            # V + A columns
    wh = wh.at[:, 8:8 + NUM_ACTIONS].set(wa)             # pure A columns
    bh = jnp.zeros((1, HEAD_PAD), jnp.float32)
    bh = bh.at[:, 0:NUM_ACTIONS].set(ba + bv)
    bh = bh.at[:, 8:8 + NUM_ACTIONS].set(ba)

    return dict(
        w1=w1.astype(jnp.bfloat16), b1=params["b1"],
        w2=params["w2"].astype(jnp.bfloat16), b2=params["b2"],
        w3=params["w3"].astype(jnp.bfloat16), b3=params["b3"],
        w4=params["w4"].astype(jnp.bfloat16), b4=params["b4"],
        wh=wh.astype(jnp.bfloat16), bh=bh,
    )


def network_forward(x, packed):
    """x: (B, 21) float32.  packed: output of pack_params.  Returns Q: (B, 5) f32."""
    B = x.shape[0]
    if B <= 1024:
        tile_b = _round_up(B, 16)      # >=16 sublanes: native bf16 (16,128) tile
    else:
        tile_b = 1024                  # amortize ~600-cycle per-step overhead
    B_pad = _round_up(B, tile_b)
    n_tiles = B_pad // tile_b

    # Single pad (batch rows + feature columns), then bf16 cast for the MXU.
    x_p = jnp.pad(x, ((0, B_pad - B), (0, IN_PAD - IN_FEATURES)))
    x_p = x_p.astype(jnp.bfloat16)

    const = lambda i: (0, 0)  # resident weights across the batch grid

    out, psums = pl.pallas_call(
        _make_kernel(B, tile_b, n_tiles),
        out_shape=(
            jax.ShapeDtypeStruct((B_pad, HEAD_PAD), jnp.float32),
            jax.ShapeDtypeStruct((n_tiles, SUBLANES, HEAD_PAD), jnp.float32),
        ),
        grid_spec=pltpu.PrefetchScalarGridSpec(
            num_scalar_prefetch=0,
            grid=(n_tiles,),
            in_specs=[
                pl.BlockSpec((tile_b, IN_PAD), lambda i: (i, 0)),   # x tiles
                pl.BlockSpec((IN_PAD, HIDDEN), const),              # w1
                pl.BlockSpec((1, HIDDEN), const),                   # b1
                pl.BlockSpec((HIDDEN, HIDDEN), const),              # w2
                pl.BlockSpec((1, HIDDEN), const),                   # b2
                pl.BlockSpec((HIDDEN, HIDDEN), const),              # w3
                pl.BlockSpec((1, HIDDEN), const),                   # b3
                pl.BlockSpec((HIDDEN, HIDDEN), const),              # w4
                pl.BlockSpec((1, HIDDEN), const),                   # b4
                pl.BlockSpec((HIDDEN, HEAD_PAD), const),            # fused head W
                pl.BlockSpec((1, HEAD_PAD), const),                 # fused head b
            ],
            out_specs=[
                pl.BlockSpec((tile_b, HEAD_PAD), lambda i: (i, 0)),      # V+A / A
                pl.BlockSpec((1, SUBLANES, HEAD_PAD), lambda i: (i, 0, 0)),  # A sums
            ],
        ),
        # No cross-tile state: batch tiles are independent -> parallel
        # (splits tiles across the two TensorCores on v7x; no-op on v5e/v6e).
        compiler_params=pltpu.CompilerParams(
            dimension_semantics=("parallel",)),
    )(x_p,
      packed["w1"], packed["b1"], packed["w2"], packed["b2"],
      packed["w3"], packed["b3"], packed["w4"], packed["b4"],
      packed["wh"], packed["bh"])

    # Global A-mean and final dueling correction done on tiny arrays here.
    a_sum = jnp.sum(psums[:, 0, 8:8 + NUM_ACTIONS])
    avg_a = a_sum / jnp.float32(B * NUM_ACTIONS)
    return out[:B, :NUM_ACTIONS] - avg_a


def init_params(key):
    """Deterministic init mimicking PyTorch Linear's U(-1/sqrt(fan_in), 1/sqrt(fan_in))."""
    layer_dims = [21, 256, 256, 256, 256]
    params = {}
    keys = jax.random.split(key, 2 * (len(layer_dims) - 1) + 4)
    ki = 0

    def linear(kw, kb, fan_in, fan_out):
        bound = 1.0 / jnp.sqrt(jnp.float32(fan_in))
        w = jax.random.uniform(kw, (fan_in, fan_out), jnp.float32, -bound, bound)
        b = jax.random.uniform(kb, (1, fan_out), jnp.float32, -bound, bound)
        return w, b

    for i in range(len(layer_dims) - 1):
        w, b = linear(keys[ki], keys[ki + 1], layer_dims[i], layer_dims[i + 1])
        ki += 2
        params[f"w{i + 1}"] = w
        params[f"b{i + 1}"] = b

    params["wv"], params["bv"] = linear(keys[ki], keys[ki + 1], 256, 1)
    ki += 2
    params["wa"], params["ba"] = linear(keys[ki], keys[ki + 1], 256, 5)
    return params


if __name__ == "__main__":
    key = jax.random.PRNGKey(0)
    pkey, xkey = jax.random.split(key)

    params = init_params(pkey)
    packed = pack_params(params)

    B = 8  # small batch (RL inference style)
    x = jax.random.normal(xkey, (B, IN_FEATURES), jnp.float32)

    q = network_forward(x, packed)
    jax.block_until_ready(q)

    # Pure-JAX f32 reference (same math, no Pallas).
    h = x
    for i in range(1, 5):
        h = jnp.maximum(h @ params[f"w{i}"] + params[f"b{i}"], 0.0)
    v_ref = h @ params["wv"] + params["bv"]
    a_ref = h @ params["wa"] + params["ba"]
    q_want = v_ref + (a_ref - jnp.mean(a_ref))

    assert q.shape == (B, NUM_ACTIONS)
    # Tolerance loosened vs. pure-f32 because matmul operands are bf16.
    max_err = float(jnp.max(jnp.abs(q - q_want)))
    assert jnp.allclose(q, q_want, atol=3e-2, rtol=3e-2), f"max abs err {max_err}"

    print("KERNEL_OK")
</pallas_src>

<mosaic_0001>
module attributes {stable_mosaic.version = 11 : i64} {
  func.func @kernel(%arg0: i32, %arg1: memref<16x32xbf16, #tpu.memory_space<vmem>>, %arg2: memref<32x256xbf16, #tpu.memory_space<vmem>>, %arg3: memref<1x256xf32, #tpu.memory_space<vmem>>, %arg4: memref<256x256xbf16, #tpu.memory_space<vmem>>, %arg5: memref<1x256xf32, #tpu.memory_space<vmem>>, %arg6: memref<256x256xbf16, #tpu.memory_space<vmem>>, %arg7: memref<1x256xf32, #tpu.memory_space<vmem>>, %arg8: memref<256x256xbf16, #tpu.memory_space<vmem>>, %arg9: memref<1x256xf32, #tpu.memory_space<vmem>>, %arg10: memref<256x128xbf16, #tpu.memory_space<vmem>>, %arg11: memref<1x128xf32, #tpu.memory_space<vmem>>, %arg12: memref<16x128xf32, #tpu.memory_space<vmem>>, %arg13: memref<1x8x128xf32, #tpu.memory_space<vmem>>) attributes {dimension_semantics = [#tpu.dimension_semantics<parallel>], iteration_bounds = array<i64: 1>, scalar_prefetch = 0 : i64, scratch_operands = 0 : i64, tpu.core_type = #tpu.core_type<tc>, window_params = [{transform_indices = @transform_0, window_bounds = array<i64: 16, 32>}, {pipeline_mode = #tpu.pipeline_mode<synchronous>, transform_indices = @transform_1, window_bounds = array<i64: 32, 256>}, {pipeline_mode = #tpu.pipeline_mode<synchronous>, transform_indices = @transform_2, window_bounds = array<i64: 1, 256>}, {pipeline_mode = #tpu.pipeline_mode<synchronous>, transform_indices = @transform_3, window_bounds = array<i64: 256, 256>}, {pipeline_mode = #tpu.pipeline_mode<synchronous>, transform_indices = @transform_4, window_bounds = array<i64: 1, 256>}, {pipeline_mode = #tpu.pipeline_mode<synchronous>, transform_indices = @transform_5, window_bounds = array<i64: 256, 256>}, {pipeline_mode = #tpu.pipeline_mode<synchronous>, transform_indices = @transform_6, window_bounds = array<i64: 1, 256>}, {pipeline_mode = #tpu.pipeline_mode<synchronous>, transform_indices = @transform_7, window_bounds = array<i64: 256, 256>}, {pipeline_mode = #tpu.pipeline_mode<synchronous>, transform_indices = @transform_8, window_bounds = array<i64: 1, 256>}, {pipeline_mode = #tpu.pipeline_mode<synchronous>, transform_indices = @transform_9, window_bounds = array<i64: 256, 128>}, {pipeline_mode = #tpu.pipeline_mode<synchronous>, transform_indices = @transform_10, window_bounds = array<i64: 1, 128>}, {transform_indices = @transform_11, window_bounds = array<i64: 16, 128>}, {transform_indices = @transform_12, window_bounds = array<i64: 1, 8, 128>}]} {
    %c0 = arith.constant 0 : index
    %c0_0 = arith.constant 0 : index
    %0 = vector.load %arg1[%c0, %c0_0] : memref<16x32xbf16, #tpu.memory_space<vmem>>, vector<16x32xbf16>
    %c0_1 = arith.constant 0 : index
    %c0_2 = arith.constant 0 : index
    %1 = vector.load %arg2[%c0_1, %c0_2] : memref<32x256xbf16, #tpu.memory_space<vmem>>, vector<32x256xbf16>
    %cst = arith.constant dense<0.000000e+00> : vector<16x256xf32>
    %2 = tpu.matmul %0, %1, %cst {dimension_numbers = #tpu.dot_dimension_numbers<[1], [0], [0], [1], [0, 0, 1, 1], [], []>} : vector<16x32xbf16>, vector<32x256xbf16>, vector<16x256xf32> -> vector<16x256xf32>
    %c0_3 = arith.constant 0 : index
    %c0_4 = arith.constant 0 : index
    %3 = vector.load %arg3[%c0_3, %c0_4] : memref<1x256xf32, #tpu.memory_space<vmem>>, vector<1x256xf32>
    %4 = vector.broadcast %3 : vector<1x256xf32> to vector<16x256xf32>
    %5 = arith.addf %2, %4 : vector<16x256xf32>
    %cst_5 = arith.constant 0.000000e+00 : f32
    %6 = vector.broadcast %cst_5 : f32 to vector<16x256xf32>
    %7 = arith.maximumf %5, %6 : vector<16x256xf32>
    %8 = arith.truncf %7 : vector<16x256xf32> to vector<16x256xbf16>
    %c0_6 = arith.constant 0 : index
    %c0_7 = arith.constant 0 : index
    %9 = vector.load %arg4[%c0_6, %c0_7] : memref<256x256xbf16, #tpu.memory_space<vmem>>, vector<256x256xbf16>
    %cst_8 = arith.constant dense<0.000000e+00> : vector<16x256xf32>
    %10 = tpu.matmul %8, %9, %cst_8 {dimension_numbers = #tpu.dot_dimension_numbers<[1], [0], [0], [1], [0, 0, 1, 1], [], []>} : vector<16x256xbf16>, vector<256x256xbf16>, vector<16x256xf32> -> vector<16x256xf32>
    %c0_9 = arith.constant 0 : index
    %c0_10 = arith.constant 0 : index
    %11 = vector.load %arg5[%c0_9, %c0_10] : memref<1x256xf32, #tpu.memory_space<vmem>>, vector<1x256xf32>
    %12 = vector.broadcast %11 : vector<1x256xf32> to vector<16x256xf32>
    %13 = arith.addf %10, %12 : vector<16x256xf32>
    %cst_11 = arith.constant 0.000000e+00 : f32
    %14 = vector.broadcast %cst_11 : f32 to vector<16x256xf32>
    %15 = arith.maximumf %13, %14 : vector<16x256xf32>
    %16 = arith.truncf %15 : vector<16x256xf32> to vector<16x256xbf16>
    %c0_12 = arith.constant 0 : index
    %c0_13 = arith.constant 0 : index
    %17 = vector.load %arg6[%c0_12, %c0_13] : memref<256x256xbf16, #tpu.memory_space<vmem>>, vector<256x256xbf16>
    %cst_14 = arith.constant dense<0.000000e+00> : vector<16x256xf32>
    %18 = tpu.matmul %16, %17, %cst_14 {dimension_numbers = #tpu.dot_dimension_numbers<[1], [0], [0], [1], [0, 0, 1, 1], [], []>} : vector<16x256xbf16>, vector<256x256xbf16>, vector<16x256xf32> -> vector<16x256xf32>
    %c0_15 = arith.constant 0 : index
    %c0_16 = arith.constant 0 : index
    %19 = vector.load %arg7[%c0_15, %c0_16] : memref<1x256xf32, #tpu.memory_space<vmem>>, vector<1x256xf32>
    %20 = vector.broadcast %19 : vector<1x256xf32> to vector<16x256xf32>
    %21 = arith.addf %18, %20 : vector<16x256xf32>
    %cst_17 = arith.constant 0.000000e+00 : f32
    %22 = vector.broadcast %cst_17 : f32 to vector<16x256xf32>
    %23 = arith.maximumf %21, %22 : vector<16x256xf32>
    %24 = arith.truncf %23 : vector<16x256xf32> to vector<16x256xbf16>
    %c0_18 = arith.constant 0 : index
    %c0_19 = arith.constant 0 : index
    %25 = vector.load %arg8[%c0_18, %c0_19] : memref<256x256xbf16, #tpu.memory_space<vmem>>, vector<256x256xbf16>
    %cst_20 = arith.constant dense<0.000000e+00> : vector<16x256xf32>
    %26 = tpu.matmul %24, %25, %cst_20 {dimension_numbers = #tpu.dot_dimension_numbers<[1], [0], [0], [1], [0, 0, 1, 1], [], []>} : vector<16x256xbf16>, vector<256x256xbf16>, vector<16x256xf32> -> vector<16x256xf32>
    %c0_21 = arith.constant 0 : index
    %c0_22 = arith.constant 0 : index
    %27 = vector.load %arg9[%c0_21, %c0_22] : memref<1x256xf32, #tpu.memory_space<vmem>>, vector<1x256xf32>
    %28 = vector.broadcast %27 : vector<1x256xf32> to vector<16x256xf32>
    %29 = arith.addf %26, %28 : vector<16x256xf32>
    %cst_23 = arith.constant 0.000000e+00 : f32
    %30 = vector.broadcast %cst_23 : f32 to vector<16x256xf32>
    %31 = arith.maximumf %29, %30 : vector<16x256xf32>
    %32 = arith.truncf %31 : vector<16x256xf32> to vector<16x256xbf16>
    %c0_24 = arith.constant 0 : index
    %c0_25 = arith.constant 0 : index
    %33 = vector.load %arg10[%c0_24, %c0_25] : memref<256x128xbf16, #tpu.memory_space<vmem>>, vector<256x128xbf16>
    %cst_26 = arith.constant dense<0.000000e+00> : vector<16x128xf32>
    %34 = tpu.matmul %32, %33, %cst_26 {dimension_numbers = #tpu.dot_dimension_numbers<[1], [0], [0], [1], [0, 0, 1, 1], [], []>} : vector<16x256xbf16>, vector<256x128xbf16>, vector<16x128xf32> -> vector<16x128xf32>
    %c0_27 = arith.constant 0 : index
    %c0_28 = arith.constant 0 : index
    %35 = vector.load %arg11[%c0_27, %c0_28] : memref<1x128xf32, #tpu.memory_space<vmem>>, vector<1x128xf32>
    %36 = vector.broadcast %35 : vector<1x128xf32> to vector<16x128xf32>
    %37 = arith.addf %34, %36 : vector<16x128xf32>
    %c0_29 = arith.constant 0 : index
    %c0_30 = arith.constant 0 : index
    %38 = vector.load %arg12[%c0_29, %c0_30] : memref<16x128xf32, #tpu.memory_space<vmem>>, vector<16x128xf32>
    tpu.vector_store %arg12[%c0_29, %c0_30], %37 {strides = array<i32>} : memref<16x128xf32, #tpu.memory_space<vmem>>, vector<16x128xf32>,
    %39 = tpu.iota {dimensions = array<i32: 0>} : vector<16x128xi32>
    %c0_i32 = arith.constant 0 : i32
    %40 = vector.broadcast %c0_i32 : i32 to vector<16x128xi32>
    %41 = arith.addi %40, %39 : vector<16x128xi32>
    %c8_i32 = arith.constant 8 : i32
    %42 = vector.broadcast %c8_i32 : i32 to vector<16x128xi32>
    %43 = arith.cmpi slt, %41, %42 : vector<16x128xi32>
    %cst_31 = arith.constant 0.000000e+00 : f32
    %44 = vector.broadcast %cst_31 : f32 to vector<16x128xf32>
    %45 = arith.select %43, %37, %44 : vector<16x128xi1>, vector<16x128xf32>
    %cst_32 = arith.constant dense<0.000000e+00> : vector<128xf32>
    %46 = vector.multi_reduction <add>, %45, %cst_32 [0] : vector<16x128xf32> to vector<128xf32>
    %47 = vector.shape_cast %46 : vector<128xf32> to vector<1x128xf32>
    %48 = vector.shape_cast %47 : vector<1x128xf32> to vector<1x128xf32>
    %49 = vector.broadcast %48 : vector<1x128xf32> to vector<8x128xf32>
    %c0_33 = arith.constant 0 : index
    %c0_34 = arith.constant 0 : index
    %c0_35 = arith.constant 0 : index
    %50 = vector.load %arg13[%c0_33, %c0_34, %c0_35] : memref<1x8x128xf32, #tpu.memory_space<vmem>>, vector<1x8x128xf32>
    %51 = vector.shape_cast %50 : vector<1x8x128xf32> to vector<8x128xf32>
    %52 = vector.shape_cast %49 : vector<8x128xf32> to vector<1x8x128xf32>
    tpu.vector_store %arg13[%c0_33, %c0_34, %c0_35], %52 {strides = array<i32>} : memref<1x8x128xf32, #tpu.memory_space<vmem>>, vector<1x8x128xf32>,
    return
  }
  func.func @transform_0(%arg0: i32) -> (i32, i32) {
    %c0_i32 = arith.constant 0 : i32
    %c0_i32_0 = arith.constant 0 : i32
    return %arg0, %c0_i32 : i32, i32
  }
  func.func @transform_1(%arg0: i32) -> (i32, i32) {
    %c0_i32 = arith.constant 0 : i32
    %c0_i32_0 = arith.constant 0 : i32
    %c0_i32_1 = arith.constant 0 : i32
    return %c0_i32, %c0_i32_0 : i32, i32
  }
  func.func @transform_2(%arg0: i32) -> (i32, i32) {
    %c0_i32 = arith.constant 0 : i32
    %c0_i32_0 = arith.constant 0 : i32
    %c0_i32_1 = arith.constant 0 : i32
    return %c0_i32, %c0_i32_0 : i32, i32
  }
  func.func @transform_3(%arg0: i32) -> (i32, i32) {
    %c0_i32 = arith.constant 0 : i32
    %c0_i32_0 = arith.constant 0 : i32
    %c0_i32_1 = arith.constant 0 : i32
    return %c0_i32, %c0_i32_0 : i32, i32
  }
  func.func @transform_4(%arg0: i32) -> (i32, i32) {
    %c0_i32 = arith.constant 0 : i32
    %c0_i32_0 = arith.constant 0 : i32
    %c0_i32_1 = arith.constant 0 : i32
    return %c0_i32, %c0_i32_0 : i32, i32
  }
  func.func @transform_5(%arg0: i32) -> (i32, i32) {
    %c0_i32 = arith.constant 0 : i32
    %c0_i32_0 = arith.constant 0 : i32
    %c0_i32_1 = arith.constant 0 : i32
    return %c0_i32, %c0_i32_0 : i32, i32
  }
  func.func @transform_6(%arg0: i32) -> (i32, i32) {
    %c0_i32 = arith.constant 0 : i32
    %c0_i32_0 = arith.constant 0 : i32
    %c0_i32_1 = arith.constant 0 : i32
    return %c0_i32, %c0_i32_0 : i32, i32
  }
  func.func @transform_7(%arg0: i32) -> (i32, i32) {
    %c0_i32 = arith.constant 0 : i32
    %c0_i32_0 = arith.constant 0 : i32
    %c0_i32_1 = arith.constant 0 : i32
    return %c0_i32, %c0_i32_0 : i32, i32
  }
  func.func @transform_8(%arg0: i32) -> (i32, i32) {
    %c0_i32 = arith.constant 0 : i32
    %c0_i32_0 = arith.constant 0 : i32
    %c0_i32_1 = arith.constant 0 : i32
    return %c0_i32, %c0_i32_0 : i32, i32
  }
  func.func @transform_9(%arg0: i32) -> (i32, i32) {
    %c0_i32 = arith.constant 0 : i32
    %c0_i32_0 = arith.constant 0 : i32
    %c0_i32_1 = arith.constant 0 : i32
    return %c0_i32, %c0_i32_0 : i32, i32
  }
  func.func @transform_10(%arg0: i32) -> (i32, i32) {
    %c0_i32 = arith.constant 0 : i32
    %c0_i32_0 = arith.constant 0 : i32
    %c0_i32_1 = arith.constant 0 : i32
    return %c0_i32, %c0_i32_0 : i32, i32
  }
  func.func @transform_11(%arg0: i32) -> (i32, i32) {
    %c0_i32 = arith.constant 0 : i32
    %c0_i32_0 = arith.constant 0 : i32
    return %arg0, %c0_i32 : i32, i32
  }
  func.func @transform_12(%arg0: i32) -> (i32, i32, i32) {
    %c0_i32 = arith.constant 0 : i32
    %c0_i32_0 = arith.constant 0 : i32
    %c0_i32_1 = arith.constant 0 : i32
    return %arg0, %c0_i32, %c0_i32_0 : i32, i32, i32
  }
}

</mosaic_0001>

<bundles_post_ra>
// kernel: tpu_custom_call.1
= control target key start
LH: loop header
LB: loop body
LE: loop exit
PB: predicated region body
PF: predicated region fallthrough
CT: control target
= control target key end

     0   :  { %18 = vsyncpa [#allocation3], 0  ;;  %s1850_s0 = inlined_call_operand.hbm [shape: bf16[16,32], index: 0, kind: input, shape index: {}]   ;;  %s1851_s1 = inlined_call_operand.hbm [shape: bf16[32,256], index: 1, kind: input, shape index: {}]   ;;  %s1852_s2 = inlined_call_operand.vmem [shape: f32[1,256], index: 2, kind: input, shape index: {}]   ;;  %s1853_s3 = inlined_call_operand.hbm [shape: bf16[256,256], index: 3, kind: input, shape index: {}]   ;;  %s1854_s4 = inlined_call_operand.vmem [shape: f32[1,256], index: 4, kind: input, shape index: {}]   ;;  %s1855_s5 = inlined_call_operand.hbm [shape: bf16[256,256], index: 5, kind: input, shape index: {}]   ;;  %s1856_s6 = inlined_call_operand.vmem [shape: f32[1,256], index: 6, kind: input, shape index: {}]   ;;  %s1857_s7 = inlined_call_operand.hbm [shape: bf16[256,256], index: 7, kind: input, shape index: {}]   ;;  %s1858_s8 = inlined_call_operand.vmem [shape: f32[1,256], index: 8, kind: input, shape index: {}]   ;;  %s1859_s9 = inlined_call_operand.hbm [shape: bf16[256,128], index: 9, kind: input, shape index: {}]   ;;  %s1860_s10 = inlined_call_operand.vmem [shape: f32[1,128], index: 10, kind: input, shape index: {}]   ;;  %s1861_s11 = inlined_call_operand.hbm [shape: f32[16,128], index: 11, kind: output, shape index: {0}]   ;;  %s1862_s12 = inlined_call_operand.hbm [shape: f32[1,8,128], index: 12, kind: output, shape index: {1}]  }
   0x1   :  { %19 = vsyncpa [#allocation6], 0 }
   0x2   :  { %20 = vsyncpa [#allocation9], 0 }
   0x3   :  { %21 = vsyncpa [#allocation12], 0 }
   0x4   :  { %22 = vsyncpa [#allocation4], 0 }
   0x5   :  { %23 = vsyncpa [#allocation15], 0  ;;  %s1700_s21 = smov [#allocation5]  }
   0x6   :  { %s41_s22 = sshll.u32 %s1700_s21, 4  ;;  %s42_s22 = int_to_ptr.vmem [resolvable:$true] %s41_s22 }
   0x7   :  { %s1536_s23 = scalar_lea.vmem %s42_s22, 512  ;;  %p1541_p1 = scmp.lt.s32.totalorder %s42_s22, %s42_s22 }
   0x8   :  { %p1537_p0 = scmp.ne.s32.totalorder %s42_s22, %s1536_s23  ;;  %p1542_p2 = scmp.lt.s32.totalorder %s1536_s23, %s1536_s23 }
   0xa   :  { %p1543_p3 = por %p1542_p2, %p1541_p1 }
   0xc   :  { %p1544_p4 = pnand %p1543_p3, %p1537_p0 }
   0xe   :  { %1547 = shalt.err (!%p1544_p4)
}
   0xf   :  { %s1701_s24 = smov 128   ;;  %s1702_s25 = smov 8  }
  0x10   :  { %47 = dma.hbm_to_vmem [thread:$0]  %s1851_s1, 512, %s42_s22, [#allocation6], %s1701_s24, %s1701_s24, %s1702_s25  }
  0x11   :  { %s1703_s28 = smov [#allocation8]   ;;  %s1704_s30 = smov [#allocation2]  }
  0x12   :  { %s69_s29 = sshll.u32 %s1703_s28, 4  ;;  %s29_s13 = sshll.u32 %s1704_s30, 4  ;;  %s70_s29 = int_to_ptr.vmem [resolvable:$true] %s69_s29  ;;  %s30_s13 = int_to_ptr.vmem [resolvable:$true] %s29_s13 }
  0x13   :  { %s1556_s14 = scalar_lea.vmem %s70_s29, 4096  ;;  %p1561_p6 = scmp.lt.s32.totalorder %s70_s29, %s70_s29 }
  0x14   :  { %p1557_p5 = scmp.ne.s32.totalorder %s70_s29, %s1556_s14  ;;  %p1562_p7 = scmp.lt.s32.totalorder %s1556_s14, %s1556_s14 }
  0x16   :  { %p1563_p8 = por %p1562_p7, %p1561_p6 }
  0x18   :  { %p1564_p9 = pnand %p1563_p8, %p1557_p5 }
  0x1a   :  { %1567 = shalt.err (!%p1564_p9)
}
  0x1b   :  { %75 = dma.hbm_to_vmem [thread:$0]  %s1855_s5, 4096, %s70_s29, [#allocation9], %s1701_s24, %s1701_s24, %s1702_s25  }
  0x1c   :  { %s1576_s1 = scalar_lea.vmem %s30_s13, 128  ;;  %p1581_p11 = scmp.lt.s32.totalorder %s30_s13, %s30_s13 }
  0x1d   :  { %p1577_p10 = scmp.ne.s32.totalorder %s30_s13, %s1576_s1  ;;  %p1582_p12 = scmp.lt.s32.totalorder %s1576_s1, %s1576_s1 }
  0x1f   :  { %p1583_p13 = por %p1582_p12, %p1581_p11 }
  0x21   :  { %p1584_p0 = pnand %p1583_p13, %p1577_p10 }
  0x23   :  { %1587 = shalt.err (!%p1584_p0)
}
  0x24   :  { %s1705_s17 = smov 64   ;;  %s1706_s18 = smov 4  }
  0x25   :  { %35 = dma.hbm_to_vmem [thread:$0]  %s1850_s0, 128, %s30_s13, [#allocation3], %s1705_s17, %s1705_s17, %s1706_s18  }
  0x26   :  { %s1707_s21 = smov [#allocation7]   ;;  %s1708_s5 = smov [#allocation10]  }
  0x27   :  { %s55_s22 = sshll.u32 %s1707_s21, 4  ;;  %s83_s23 = sshll.u32 %s1708_s5, 4  ;;  %s56_s22 = int_to_ptr.vmem [resolvable:$true] %s55_s22  ;;  %s84_s23 = int_to_ptr.vmem [resolvable:$true] %s83_s23 }
  0x28   :  { %s1596_s26 = scalar_lea.vmem %s56_s22, 4096  ;;  %p1601_p2 = scmp.lt.s32.totalorder %s56_s22, %s56_s22 }
  0x29   :  { %p1597_p1 = scmp.ne.s32.totalorder %s56_s22, %s1596_s26  ;;  %p1602_p3 = scmp.lt.s32.totalorder %s1596_s26, %s1596_s26 }
  0x2b   :  { %p1603_p4 = por %p1602_p3, %p1601_p2 }
  0x2d   :  { %p1604_p5 = pnand %p1603_p4, %p1597_p1 }
  0x2f   :  { %1607 = shalt.err (!%p1604_p5)
}
  0x30   :  { %61 = dma.hbm_to_vmem [thread:$0]  %s1853_s3, 4096, %s56_s22, [#allocation6], %s1701_s24, %s1701_s24, %s1702_s25  }
  0x31   :  { %s1616_s0 = scalar_lea.vmem %s84_s23, 4096  ;;  %p1621_p7 = scmp.lt.s32.totalorder %s84_s23, %s84_s23 }
  0x32   :  { %p1617_p6 = scmp.ne.s32.totalorder %s84_s23, %s1616_s0  ;;  %p1622_p8 = scmp.lt.s32.totalorder %s1616_s0, %s1616_s0 }
  0x34   :  { %p1623_p9 = por %p1622_p8, %p1621_p7 }
  0x36   :  { %p1624_p10 = pnand %p1623_p9, %p1617_p6 }
  0x38   :  { %1627 = shalt.err (!%p1624_p10)
}
  0x39   :  { %89 = dma.hbm_to_vmem [thread:$0]  %s1857_s7, 4096, %s84_s23, [#allocation9], %s1701_s24, %s1701_s24, %s1702_s25  }
  0x3a   :  { %s1709_s13 = smov [#allocation11]  }
  0x3b   :  { %s97_s14 = sshll.u32 %s1709_s13, 4  ;;  %s98_s14 = int_to_ptr.vmem [resolvable:$true] %s97_s14 }
  0x3c   :  { %s1636_s15 = scalar_lea.vmem %s98_s14, 2048  ;;  %p1641_p12 = scmp.lt.s32.totalorder %s98_s14, %s98_s14 }
  0x3d   :  { %p1637_p11 = scmp.ne.s32.totalorder %s98_s14, %s1636_s15  ;;  %p1642_p13 = scmp.lt.s32.totalorder %s1636_s15, %s1636_s15 }
  0x3f   :  { %p1643_p0 = por %p1642_p13, %p1641_p12 }
  0x41   :  { %p1644_p1 = pnand %p1643_p0, %p1637_p11 }
  0x43   :  { %1647 = shalt.err (!%p1644_p1)
}
  0x44   :  { %103 = dma.hbm_to_vmem [thread:$0]  %s1859_s9, 2048, %s98_s14, [#allocation12], %s1705_s17, %s1705_s17, %s1706_s18  }
  0x45   :  { %1688 = dma.done.wait [#allocation3], 128  }
  0x46   :  { %1689 = vsyncadd [#allocation3], 4294967168 }
  0x47   :  { %1690 = dma.done.wait [#allocation6], 4608  }
  0x48   :  { %1691 = vsyncadd [#allocation6], 4294962688 }
  0x49   :  { %1692 = dma.done.wait [#allocation9], 8192  }
  0x4a   :  { %1693 = vsyncadd [#allocation9], 4294959104 }
  0x4b   :  { %1694 = dma.done.wait [#allocation12], 2048  }
  0x4c   :  { %1695 = vsyncadd [#allocation12], 4294965248  ;;  %v1710_v0 = vmov 0   ;;  %v1361_v1 = vld [vmem:[#allocation5 + $0x14] ss:$8 sps:$4 sm:$0xff]   ;;  %vm168_vm0 = vcmask 261120  }
  0x4d   :  { %204 = vmatprep.mubr.bf16.mxu0 %v1710_v0  ;;  %v1363_v2 = vld [vmem:[#allocation5 + $0x10] ss:$8 sps:$4 sm:$0xff]   ;;  %184 = vmatprep.subr.bf16.mxu0 %v1361_v1  ;;  %v1364_v3 = vld [vmem:[#allocation5 + $0x4] ss:$8 sps:$4 sm:$0xff]   ;;  %v1366_v4 = vld [vmem:[#allocation5] ss:$8 sps:$4 sm:$0xff]   ;;  %v133_v0 = vlaneseq }
  0x4e   :  { %185 = vmatpush1.bf16.msra.mxu0 %v1363_v2  ;;  %v1368_v5 = vld [vmem:[#allocation7 + $0x74] ss:$8 sps:$4 sm:$0xff]   ;;  %v1370_v6 = vld [vmem:[#allocation7 + $0x70] ss:$8 sps:$4 sm:$0xff]   ;;  %v1371_v7 = vld [vmem:[#allocation7 + $0x64] ss:$8 sps:$4 sm:$0xff]  }
  0x4f   :  { %186 = vmatprep.subr.bf16.mxu0 %v1364_v3  ;;  %v1367_v8 = vld [vmem:[#allocation2] sm:$0xff]   ;;  %425 = vmatprep.subr.bf16.mxu1 %v1368_v5  ;;  %v1373_v9 = vld [vmem:[#allocation7 + $0x60] ss:$8 sps:$4 sm:$0xff]   ;;  %v1377_v12 = vld [vmem:[#allocation7 + $0x44] ss:$8 sps:$4 sm:$0xff]   ;;  %v134_v1 = vshrl.u32 %v133_v0, 7 }
  0x50   :  { %426 = vmatpush1.bf16.msra.mxu1 %v1370_v6  ;;  %v1374_v10 = vld [vmem:[#allocation7 + $0x54] ss:$8 sps:$4 sm:$0xff]   ;;  %v1376_v11 = vld [vmem:[#allocation7 + $0x50] ss:$8 sps:$4 sm:$0xff]   ;;  %v1379_v13 = vld [vmem:[#allocation7 + $0x40] ss:$8 sps:$4 sm:$0xff]  }
  0x51   :  { %427 = vmatprep.subr.bf16.mxu1 %v1371_v7  ;;  %v1380_v14 = vld [vmem:[#allocation7 + $0x34] ss:$8 sps:$4 sm:$0xff]   ;;  %v1382_v15 = vld [vmem:[#allocation7 + $0x30] ss:$8 sps:$4 sm:$0xff]   ;;  %v1383_v16 = vld [vmem:[#allocation7 + $0x24] ss:$8 sps:$4 sm:$0xff]  }
  0x52   :  { %187 = vmatpush1.bf16.msra.mxu0 %v1366_v4  ;;  %v1385_v17 = vld [vmem:[#allocation7 + $0x20] ss:$8 sps:$4 sm:$0xff]   ;;  %v1386_v18 = vld [vmem:[#allocation7 + $0x14] ss:$8 sps:$4 sm:$0xff]   ;;  %v1388_v19 = vld [vmem:[#allocation7 + $0x10] ss:$8 sps:$4 sm:$0xff]  }
  0x53   :  { %v1389_v20 = vld [vmem:[#allocation7 + $0x4] ss:$8 sps:$4 sm:$0xff]   ;;  %v1391_v21 = vld [vmem:[#allocation7] ss:$8 sps:$4 sm:$0xff]   ;;  %v1392_v22 = vld [vmem:[#allocation7 + $0xf4] ss:$8 sps:$4 sm:$0xff]  }
  0x54   :  { %428 = vmatpush1.bf16.msra.mxu1 %v1373_v9  ;;  %v1394_v23 = vld [vmem:[#allocation7 + $0xf0] ss:$8 sps:$4 sm:$0xff]   ;;  %v1395_v24 = vld [vmem:[#allocation7 + $0xe4] ss:$8 sps:$4 sm:$0xff]   ;;  %v1397_v25 = vld [vmem:[#allocation7 + $0xe0] ss:$8 sps:$4 sm:$0xff]  }
  0x55   :  { %1212 = vmatmul.mubr.msk.bf16.vlgmr.msra.gmra.mxu0 %vm168_vm0, %v1367_v8  ;;  %429 = vmatprep.subr.bf16.mxu1 %v1374_v10  ;;  %v1398_v26 = vld [vmem:[#allocation7 + $0xd4] ss:$8 sps:$4 sm:$0xff]   ;;  %v1400_v27 = vld [vmem:[#allocation7 + $0xd0] ss:$8 sps:$4 sm:$0xff]   ;;  %v1401_v28 = vld [vmem:[#allocation7 + $0xc4] ss:$8 sps:$4 sm:$0xff]  }
  0x56   :  { %v1403_v29 = vld [vmem:[#allocation7 + $0xc0] ss:$8 sps:$4 sm:$0xff]   ;;  %v1404_v30 = vld [vmem:[#allocation7 + $0xb4] ss:$8 sps:$4 sm:$0xff]   ;;  %v1406_v31 = vld [vmem:[#allocation7 + $0xb0] ss:$8 sps:$4 sm:$0xff]  }
  0x57   :  { %v1407_v32 = vld [vmem:[#allocation7 + $0xa4] ss:$8 sps:$4 sm:$0xff]   ;;  %v1409_v33 = vld [vmem:[#allocation7 + $0xa0] ss:$8 sps:$4 sm:$0xff]   ;;  %v1410_v34 = vld [vmem:[#allocation7 + $0x94] ss:$8 sps:$4 sm:$0xff]  }
  0x58   :  { %430 = vmatpush1.bf16.msra.mxu1 %v1376_v11  ;;  %v1412_v35 = vld [vmem:[#allocation7 + $0x90] ss:$8 sps:$4 sm:$0xff]   ;;  %v1413_v36 = vld [vmem:[#allocation7 + $0x84] ss:$8 sps:$4 sm:$0xff]   ;;  %v1415_v37 = vld [vmem:[#allocation7 + $0x80] ss:$8 sps:$4 sm:$0xff]  }
  0x59   :  { %431 = vmatprep.subr.bf16.mxu1 %v1377_v12  ;;  %v1416_v38 = vld [vmem:[#allocation8 + $0x70] ss:$8 sps:$4 sm:$0xff]   ;;  %v1418_v39 = vld [vmem:[#allocation8 + $0x74] ss:$8 sps:$4 sm:$0xff]   ;;  %v1421_v40 = vld [vmem:[#allocation8 + $0x64] ss:$8 sps:$4 sm:$0xff]  }
  0x5a   :  { %678 = vmatprep.subr.bf16.mxu0 %v1418_v39  ;;  %v1419_v41 = vld [vmem:[#allocation8 + $0x60] ss:$8 sps:$4 sm:$0xff]   ;;  %v1424_v42 = vld [vmem:[#allocation8 + $0x54] ss:$8 sps:$4 sm:$0xff]   ;;  %v1422_v43 = vld [vmem:[#allocation8 + $0x50] ss:$8 sps:$4 sm:$0xff]  }
  0x5b   :  { %679 = vmatpush1.bf16.msra.mxu0 %v1416_v38  ;;  %v1427_v44 = vld [vmem:[#allocation8 + $0x44] ss:$8 sps:$4 sm:$0xff]   ;;  %v1425_v45 = vld [vmem:[#allocation8 + $0x40] ss:$8 sps:$4 sm:$0xff]   ;;  %v1430_v46 = vld [vmem:[#allocation8 + $0x34] ss:$8 sps:$4 sm:$0xff]  }
  0x5c   :  { %432 = vmatpush1.bf16.msra.mxu1 %v1379_v13  ;;  %680 = vmatprep.subr.bf16.mxu0 %v1421_v40  ;;  %v1428_v47 = vld [vmem:[#allocation8 + $0x30] ss:$8 sps:$4 sm:$0xff]   ;;  %v1433_v48 = vld [vmem:[#allocation8 + $0x24] ss:$8 sps:$4 sm:$0xff]   ;;  %v1431_v49 = vld [vmem:[#allocation8 + $0x20] ss:$8 sps:$4 sm:$0xff]  }
  0x5d   :  { %433 = vmatprep.subr.bf16.mxu1 %v1380_v14  ;;  %v1436_v50 = vld [vmem:[#allocation8 + $0x14] ss:$8 sps:$4 sm:$0xff]   ;;  %v1434_v51 = vld [vmem:[#allocation8 + $0x10] ss:$8 sps:$4 sm:$0xff]   ;;  %v1439_v52 = vld [vmem:[#allocation8 + $0x4] ss:$8 sps:$4 sm:$0xff]  }
  0x5e   :  { %v1437_v53 = vld [vmem:[#allocation8] ss:$8 sps:$4 sm:$0xff]   ;;  %v1442_v54 = vld [vmem:[#allocation8 + $0xf4] ss:$8 sps:$4 sm:$0xff]   ;;  %v1440_v55 = vld [vmem:[#allocation8 + $0xf0] ss:$8 sps:$4 sm:$0xff]  }
  0x5f   :  { %681 = vmatpush1.bf16.msra.mxu0 %v1419_v41  ;;  %v1445_v56 = vld [vmem:[#allocation8 + $0xe4] ss:$8 sps:$4 sm:$0xff]   ;;  %v1443_v57 = vld [vmem:[#allocation8 + $0xe0] ss:$8 sps:$4 sm:$0xff]   ;;  %v1448_v58 = vld [vmem:[#allocation8 + $0xd4] ss:$8 sps:$4 sm:$0xff]  }
  0x60   :  { %434 = vmatpush1.bf16.msra.mxu1 %v1382_v15  ;;  %682 = vmatprep.subr.bf16.mxu0 %v1424_v42  ;;  %v1446_v59 = vld [vmem:[#allocation8 + $0xd0] ss:$8 sps:$4 sm:$0xff]   ;;  %v1451_v60 = vld [vmem:[#allocation8 + $0xc4] ss:$8 sps:$4 sm:$0xff]   ;;  %v1449_v61 = vld [vmem:[#allocation8 + $0xc0] ss:$8 sps:$4 sm:$0xff]  }
  0x61   :  { %435 = vmatprep.subr.bf16.mxu1 %v1383_v16  ;;  %v1454_v62 = vld [vmem:[#allocation8 + $0xb4] ss:$8 sps:$4 sm:$0xff]   ;;  %v1452_v63 = vld [vmem:[#allocation8 + $0xb0] ss:$8 sps:$4 sm:$0xff]   ;;  %v1814_v2 = vsub.s32 1, %v134_v1  ;;  %v1816_v3 = vsub.s32 0, %v134_v1 }
  0x62   :  { %v131_v4 = vld [vmem:[%s1852_s2] sm:$0x3]  ;;  %v1479_v38 = vld [vmem:[#allocation10 + $0x20] ss:$8 sps:$4 sm:$0xff]   ;;  %v1484_v39 = vld [vmem:[#allocation10 + $0x14] ss:$8 sps:$4 sm:$0xff]  }
  0x63   :  { %683 = vmatpush1.bf16.msra.mxu0 %v1422_v43  ;;  %v140_v6 = vrot.slane %v131_v4, %v1814_v2  ;;  %v136_v7 = vrot.slane %v131_v4, %v1816_v3  ;;  %v1482_v40 = vld [vmem:[#allocation10 + $0x10] ss:$8 sps:$4 sm:$0xff]   ;;  %v1487_v41 = vld [vmem:[#allocation10 + $0x4] ss:$8 sps:$4 sm:$0xff]   ;;  %v1485_v42 = vld [vmem:[#allocation10] ss:$8 sps:$4 sm:$0xff]  }
  0x64   :  { %436 = vmatpush1.bf16.msra.mxu1 %v1385_v17  ;;  %684 = vmatprep.subr.bf16.mxu0 %v1427_v44  ;;  %v1490_v43 = vld [vmem:[#allocation10 + $0xf4] ss:$8 sps:$4 sm:$0xff]   ;;  %v1488_v44 = vld [vmem:[#allocation10 + $0xf0] ss:$8 sps:$4 sm:$0xff]   ;;  %s1711_s20 = smov [#allocation13]  }
  0x65   :  { %437 = vmatprep.subr.bf16.mxu1 %v1386_v18  ;;  %s1178_s21 = sshll.u32 %s1711_s20, 4  ;;  %s1179_s21 = int_to_ptr.vmem [resolvable:$true] %s1178_s21 }
  0x66   :  { %s1648_s22 = scalar_lea.vmem %s1179_s21, 256  ;;  %p1653_p3 = scmp.lt.s32.totalorder %s1179_s21, %s1179_s21 }
  0x67   :  { %685 = vmatpush1.bf16.msra.mxu0 %v1425_v45  ;;  %v1493_v45 = vld [vmem:[#allocation10 + $0xe4] ss:$8 sps:$4 sm:$0xff]   ;;  %p1649_p2 = scmp.ne.s32.totalorder %s1179_s21, %s1648_s22  ;;  %p1654_p4 = scmp.lt.s32.totalorder %s1648_s22, %s1648_s22 }
  0x68   :  { %438 = vmatpush1.bf16.msra.mxu1 %v1388_v19  ;;  %686 = vmatprep.subr.bf16.mxu0 %v1430_v46  ;;  %v1491_v46 = vld [vmem:[#allocation10 + $0xe0] ss:$8 sps:$4 sm:$0xff]  }
  0x69   :  { %439 = vmatprep.subr.bf16.mxu1 %v1389_v20  ;;  %p1655_p5 = por %p1654_p4, %p1653_p3 }
  0x6b   :  { %687 = vmatpush1.bf16.msra.mxu0 %v1428_v47  ;;  %v1496_v47 = vld [vmem:[#allocation10 + $0xd4] ss:$8 sps:$4 sm:$0xff]   ;;  %p1656_p6 = pnand %p1655_p5, %p1649_p2 }
  0x6c   :  { %440 = vmatpush1.bf16.msra.mxu1 %v1391_v21  ;;  %688 = vmatprep.subr.bf16.mxu0 %v1433_v48  ;;  %v1457_v21 = vld [vmem:[#allocation8 + $0xa4] ss:$8 sps:$4 sm:$0xff]   ;;  %v1494_v48 = vld [vmem:[#allocation10 + $0xd0] ss:$8 sps:$4 sm:$0xff]  }
  0x6d   :  { %441 = vmatprep.subr.bf16.mxu1 %v1392_v22  ;;  %v1455_v22 = vld [vmem:[#allocation8 + $0xa0] ss:$8 sps:$4 sm:$0xff]  }
  0x6f   :  { %689 = vmatpush1.bf16.msra.mxu0 %v1431_v49  ;;  %v1499_v49 = vld [vmem:[#allocation10 + $0xc4] ss:$8 sps:$4 sm:$0xff]  }
  0x70   :  { %442 = vmatpush2.bf16.msra.mxu1 %v1394_v23  ;;  %690 = vmatprep.subr.bf16.mxu0 %v1436_v50  ;;  %v1460_v23 = vld [vmem:[#allocation8 + $0x94] ss:$8 sps:$4 sm:$0xff]   ;;  %v1497_v50 = vld [vmem:[#allocation10 + $0xc0] ss:$8 sps:$4 sm:$0xff]  }
  0x71   :  { %443 = vmatprep.subr.bf16.mxu1 %v1395_v24  ;;  %v1458_v24 = vld [vmem:[#allocation8 + $0x90] ss:$8 sps:$4 sm:$0xff]  }
  0x73   :  { %691 = vmatpush1.bf16.msra.mxu0 %v1434_v51  ;;  %v1502_v51 = vld [vmem:[#allocation10 + $0xb4] ss:$8 sps:$4 sm:$0xff]  }
  0x74   :  { %444 = vmatpush2.bf16.msra.mxu1 %v1397_v25  ;;  %692 = vmatprep.subr.bf16.mxu0 %v1439_v52  ;;  %v1463_v25 = vld [vmem:[#allocation8 + $0x84] ss:$8 sps:$4 sm:$0xff]   ;;  %v1500_v52 = vld [vmem:[#allocation10 + $0xb0] ss:$8 sps:$4 sm:$0xff]  }
  0x75   :  { %445 = vmatprep.subr.bf16.mxu1 %v1398_v26  ;;  %v1461_v26 = vld [vmem:[#allocation8 + $0x80] ss:$8 sps:$4 sm:$0xff]  }
  0x77   :  { %693 = vmatpush1.bf16.msra.mxu0 %v1437_v53  ;;  %v253_v53 = vld [vmem:[%s1854_s4] sm:$0x3] }
  0x78   :  { %446 = vmatpush2.bf16.msra.mxu1 %v1400_v27  ;;  %694 = vmatprep.subr.bf16.mxu0 %v1442_v54  ;;  %v1464_v27 = vld [vmem:[#allocation10 + $0x70] ss:$8 sps:$4 sm:$0xff]  }
  0x79   :  { %447 = vmatprep.subr.bf16.mxu1 %v1401_v28  ;;  %v1466_v28 = vld [vmem:[#allocation10 + $0x74] ss:$8 sps:$4 sm:$0xff]  }
  0x7b   :  { %695 = vmatpush2.bf16.msra.mxu0 %v1440_v55  ;;  %v262_v55 = vrot.slane %v253_v53, %v1814_v2 }
  0x7c   :  { %448 = vmatpush2.bf16.msra.mxu1 %v1403_v29  ;;  %696 = vmatprep.subr.bf16.mxu0 %v1445_v56  ;;  %v1469_v29 = vld [vmem:[#allocation10 + $0x64] ss:$8 sps:$4 sm:$0xff]   ;;  %v258_v56 = vrot.slane %v253_v53, %v1816_v3 }
  0x7d   :  { %449 = vmatprep.subr.bf16.mxu1 %v1404_v30  ;;  %v1467_v30 = vld [vmem:[#allocation10 + $0x60] ss:$8 sps:$4 sm:$0xff]  }
  0x7f   :  { %697 = vmatpush2.bf16.msra.mxu0 %v1443_v57 }
  0x80   :  { %450 = vmatpush2.bf16.msra.mxu1 %v1406_v31  ;;  %698 = vmatprep.subr.bf16.mxu0 %v1448_v58  ;;  %v1472_v31 = vld [vmem:[#allocation10 + $0x54] ss:$8 sps:$4 sm:$0xff]  }
  0x81   :  { %451 = vmatprep.subr.bf16.mxu1 %v1407_v32  ;;  %v1470_v32 = vld [vmem:[#allocation10 + $0x50] ss:$8 sps:$4 sm:$0xff]  }
  0x83   :  { %699 = vmatpush2.bf16.msra.mxu0 %v1446_v59 }
  0x84   :  { %452 = vmatpush2.bf16.msra.mxu1 %v1409_v33  ;;  %700 = vmatprep.subr.bf16.mxu0 %v1451_v60  ;;  %v1475_v33 = vld [vmem:[#allocation10 + $0x44] ss:$8 sps:$4 sm:$0xff]  }
  0x85   :  { %453 = vmatprep.subr.bf16.mxu1 %v1410_v34  ;;  %v1473_v34 = vld [vmem:[#allocation10 + $0x40] ss:$8 sps:$4 sm:$0xff]  }
  0x87   :  { %701 = vmatpush2.bf16.msra.mxu0 %v1449_v61 }
  0x88   :  { %454 = vmatpush2.bf16.msra.mxu1 %v1412_v35  ;;  %702 = vmatprep.subr.bf16.mxu0 %v1454_v62  ;;  %v1478_v35 = vld [vmem:[#allocation10 + $0x34] ss:$8 sps:$4 sm:$0xff]  }
  0x89   :  { %455 = vmatprep.subr.bf16.mxu1 %v1413_v36  ;;  %v1476_v36 = vld [vmem:[#allocation10 + $0x30] ss:$8 sps:$4 sm:$0xff]  }
  0x8b   :  { %703 = vmatpush2.bf16.msra.mxu0 %v1452_v63 }
  0x8c   :  { %456 = vmatpush2.bf16.msra.mxu1 %v1415_v37  ;;  %704 = vmatprep.subr.bf16.mxu0 %v1457_v21  ;;  %v1481_v37 = vld [vmem:[#allocation10 + $0x24] ss:$8 sps:$4 sm:$0xff]  }
  0x8d   :  { %931 = vmatprep.subr.bf16.mxu1 %v1466_v28  ;;  %v1519_v21 = vld [vmem:[#allocation11 + $0x20] sm:$0xff]  }
  0x8f   :  { %705 = vmatpush2.bf16.msra.mxu0 %v1455_v22  ;;  %v1520_v22 = vld [vmem:[#allocation11 + $0x58] sm:$0xff]  }
  0x90   :  { %706 = vmatprep.subr.bf16.mxu0 %v1460_v23  ;;  %v1521_v23 = vld [vmem:[#allocation11 + $0x18] sm:$0xff]  }
  0x93   :  { %707 = vmatpush2.bf16.msra.mxu0 %v1458_v24  ;;  %v506_v24 = vld [vmem:[%s1856_s6] sm:$0x3] }
  0x94   :  { %708 = vmatprep.subr.bf16.mxu0 %v1463_v25 }
  0x97   :  { %709 = vmatpush2.bf16.msra.mxu0 %v1461_v26  ;;  %v515_v26 = vrot.slane %v506_v24, %v1814_v2 }
 0x115   :  { %v206_v5 = vpop.f32.mrf.mxu0 }
 0x116   :  { %v207_v12 = vadd.f32 %v206_v5, %v136_v7 }
 0x117   :  { %v208_v8 = vpop.f32.mrf.mxu0 }
 0x118   :  { %v209_v10 = vadd.f32 %v208_v8, %v140_v6  ;;  %v215_v18 = vmax.f32 %v207_v12, 0.0  ;;  %v1505_v8 = vld [vmem:[#allocation10 + $0xa4] ss:$8 sps:$4 sm:$0xff]  }
 0x119   :  { %v210_v9 = vpop.f32.mrf.mxu0  ;;  %v1511_v12 = vld [vmem:[#allocation10 + $0x84] ss:$8 sps:$4 sm:$0xff]  }
 0x11a   :  { %v211_v11 = vadd.f32 %v210_v9, %v136_v7  ;;  %v216_v16 = vmax.f32 %v209_v10, 0.0  ;;  %v1503_v9 = vld [vmem:[#allocation10 + $0xa0] ss:$8 sps:$4 sm:$0xff]   ;;  %v1508_v10 = vld [vmem:[#allocation10 + $0x94] ss:$8 sps:$4 sm:$0xff]  }
 0x11b   :  { %v212_v13 = vpop.f32.mrf.mxu0 }
 0x11c   :  { %v213_v14 = vadd.f32 %v212_v13, %v140_v6  ;;  %v217_v15 = vmax.f32 %v211_v11, 0.0  ;;  %v1506_v11 = vld [vmem:[#allocation10 + $0x90] ss:$8 sps:$4 sm:$0xff]   ;;  %v1509_v13 = vld [vmem:[#allocation10 + $0x80] ss:$8 sps:$4 sm:$0xff]  }
 0x11e   :  { %v218_v17 = vmax.f32 %v213_v14, 0.0  ;;  %v219_v20 = vpack.c.bf16 %v217_v15, %v215_v18  ;;  %v1512_v14 = vld [vmem:[#allocation11 + $0x78] sm:$0xff]   ;;  %v1516_v18 = vld [vmem:[#allocation11 + $0x68] sm:$0xff]  }
 0x11f   :  { %v1513_v15 = vld [vmem:[#allocation11 + $0x38] sm:$0xff]   ;;  %1326 = vmatprep.subr.bf16.mxu0 %v1512_v14 }
 0x120   :  { %v220_v19 = vpack.c.bf16 %v218_v17, %v216_v16  ;;  %v1514_v16 = vld [vmem:[#allocation11 + $0x70] sm:$0xff]  }
 0x121   :  { %v1515_v17 = vld [vmem:[#allocation11 + $0x30] sm:$0xff]  }
 0x122   :  { %457 = vmatprep.mubr.bf16.mxu1 %v220_v19  ;;  %v1517_v19 = vld [vmem:[#allocation11 + $0x28] sm:$0xff]  }
 0x123   :  { %458 = vmatmul.mubr.bf16.vlgmr.msra.gmra.mxu1 %v219_v20  ;;  %v1518_v20 = vld [vmem:[#allocation11 + $0x60] sm:$0xff]  }
 0x124   :  { %932 = vmatpush1.bf16.msra.mxu1 %v1464_v27  ;;  %v511_v27 = vrot.slane %v506_v24, %v1816_v3 }
 0x125   :  { %933 = vmatprep.subr.bf16.mxu1 %v1469_v29 }
 0x128   :  { %934 = vmatpush1.bf16.msra.mxu1 %v1467_v30 }
 0x129   :  { %935 = vmatprep.subr.bf16.mxu1 %v1472_v31 }
 0x12c   :  { %936 = vmatpush1.bf16.msra.mxu1 %v1470_v32 }
 0x12d   :  { %937 = vmatprep.subr.bf16.mxu1 %v1475_v33 }
 0x130   :  { %938 = vmatpush1.bf16.msra.mxu1 %v1473_v34 }
 0x131   :  { %939 = vmatprep.subr.bf16.mxu1 %v1478_v35 }
 0x134   :  { %940 = vmatpush1.bf16.msra.mxu1 %v1476_v36 }
 0x135   :  { %941 = vmatprep.subr.bf16.mxu1 %v1481_v37 }
 0x138   :  { %942 = vmatpush1.bf16.msra.mxu1 %v1479_v38 }
 0x139   :  { %943 = vmatprep.subr.bf16.mxu1 %v1484_v39 }
 0x13c   :  { %944 = vmatpush1.bf16.msra.mxu1 %v1482_v40 }
 0x13d   :  { %945 = vmatprep.subr.bf16.mxu1 %v1487_v41  ;;  %v1522_v41 = vld [vmem:[#allocation11 + $0x50] sm:$0xff]  }
 0x140   :  { %946 = vmatpush1.bf16.msra.mxu1 %v1485_v42  ;;  %v1523_v42 = vld [vmem:[#allocation11 + $0x10] sm:$0xff]  }
 0x141   :  { %947 = vmatprep.subr.bf16.mxu1 %v1490_v43  ;;  %v1524_v43 = vld [vmem:[#allocation11 + $0x48] sm:$0xff]  }
 0x144   :  { %948 = vmatpush2.bf16.msra.mxu1 %v1488_v44  ;;  %v1525_v44 = vld [vmem:[#allocation11 + $0x8] sm:$0xff]  }
 0x145   :  { %949 = vmatprep.subr.bf16.mxu1 %v1493_v45  ;;  %v1526_v45 = vld [vmem:[#allocation11 + $0x40] sm:$0xff]  }
 0x148   :  { %950 = vmatpush2.bf16.msra.mxu1 %v1491_v46  ;;  %v1527_v46 = vld [vmem:[#allocation11] sm:$0xff]  }
 0x149   :  { %951 = vmatprep.subr.bf16.mxu1 %v1496_v47  ;;  %v759_v47 = vld [vmem:[%s1858_s8] sm:$0x3] }
 0x14c   :  { %952 = vmatpush2.bf16.msra.mxu1 %v1494_v48 }
 0x14d   :  { %953 = vmatprep.subr.bf16.mxu1 %v1499_v49  ;;  %v768_v49 = vrot.slane %v759_v47, %v1814_v2  ;;  %v1309_v2 = vld [vmem:[%s1860_s10] ss:$0 sm:$0xff] }
 0x150   :  { %954 = vmatpush2.bf16.msra.mxu1 %v1497_v50  ;;  %v764_v50 = vrot.slane %v759_v47, %v1816_v3 }
 0x151   :  { %955 = vmatprep.subr.bf16.mxu1 %v1502_v51 }
 0x154   :  { %956 = vmatpush2.bf16.msra.mxu1 %v1500_v52 }
 0x155   :  { %957 = vmatprep.subr.bf16.mxu1 %v1505_v8 }
 0x158   :  { %958 = vmatpush2.bf16.msra.mxu1 %v1503_v9 }
 0x159   :  { %959 = vmatprep.subr.bf16.mxu1 %v1508_v10 }
 0x15c   :  { %960 = vmatpush2.bf16.msra.mxu1 %v1506_v11 }
 0x15d   :  { %961 = vmatprep.subr.bf16.mxu1 %v1511_v12 }
 0x160   :  { %962 = vmatpush2.bf16.msra.mxu1 %v1509_v13 }
 0x1e3   :  { %v459_v54 = vpop.f32.mrf.mxu1 }
 0x1e4   :  { %v460_v61 = vadd.f32 %v459_v54, %v258_v56 }
 0x1e5   :  { %v461_v57 = vpop.f32.mrf.mxu1 }
 0x1e6   :  { %v462_v59 = vadd.f32 %v461_v57, %v262_v55  ;;  %v468_v5 = vmax.f32 %v460_v61, 0.0 }
 0x1e7   :  { %v463_v58 = vpop.f32.mrf.mxu1 }
 0x1e8   :  { %v464_v60 = vadd.f32 %v463_v58, %v258_v56  ;;  %v469_v1 = vmax.f32 %v462_v59, 0.0 }
 0x1e9   :  { %v465_v62 = vpop.f32.mrf.mxu1 }
 0x1ea   :  { %v466_v63 = vadd.f32 %v465_v62, %v262_v55  ;;  %v470_v0 = vmax.f32 %v464_v60, 0.0 }
 0x1ec   :  { %v471_v4 = vmax.f32 %v466_v63, 0.0  ;;  %v472_v7 = vpack.c.bf16 %v470_v0, %v468_v5 }
 0x1ee   :  { %v473_v6 = vpack.c.bf16 %v471_v4, %v469_v1 }
 0x1f0   :  { %710 = vmatprep.mubr.bf16.mxu0 %v473_v6 }
 0x1f1   :  { %711 = vmatmul.mubr.bf16.vlgmr.msra.gmra.mxu0 %v472_v7 }
 0x1f2   :  { %1327 = vmatpush3.bf16.msra.mxu0 %v1513_v15 }
 0x1f3   :  { %1328 = vmatprep.subr.bf16.mxu0 %v1514_v16 }
 0x1f6   :  { %1329 = vmatpush3.bf16.msra.mxu0 %v1515_v17 }
 0x1f7   :  { %1330 = vmatprep.subr.bf16.mxu0 %v1516_v18 }
 0x1fa   :  { %1331 = vmatpush3.bf16.msra.mxu0 %v1517_v19 }
 0x1fb   :  { %1332 = vmatprep.subr.bf16.mxu0 %v1518_v20 }
 0x1fe   :  { %1333 = vmatpush3.bf16.msra.mxu0 %v1519_v21 }
 0x1ff   :  { %1334 = vmatprep.subr.bf16.mxu0 %v1520_v22 }
 0x202   :  { %1335 = vmatpush3.bf16.msra.mxu0 %v1521_v23 }
 0x203   :  { %1336 = vmatprep.subr.bf16.mxu0 %v1522_v41 }
 0x206   :  { %1337 = vmatpush3.bf16.msra.mxu0 %v1523_v42 }
 0x207   :  { %1338 = vmatprep.subr.bf16.mxu0 %v1524_v43 }
 0x20a   :  { %1339 = vmatpush3.bf16.msra.mxu0 %v1525_v44 }
 0x20b   :  { %1340 = vmatprep.subr.bf16.mxu0 %v1526_v45 }
 0x20e   :  { %1341 = vmatpush3.bf16.msra.mxu0 %v1527_v46 }
 0x2b1   :  { %v712_v25 = vpop.f32.mrf.mxu0 }
 0x2b2   :  { %v713_v32 = vadd.f32 %v712_v25, %v511_v27 }
 0x2b3   :  { %v714_v28 = vpop.f32.mrf.mxu0 }
 0x2b4   :  { %v715_v30 = vadd.f32 %v714_v28, %v515_v26  ;;  %v721_v38 = vmax.f32 %v713_v32, 0.0 }
 0x2b5   :  { %v716_v29 = vpop.f32.mrf.mxu0 }
 0x2b6   :  { %v717_v31 = vadd.f32 %v716_v29, %v511_v27  ;;  %v722_v36 = vmax.f32 %v715_v30, 0.0 }
 0x2b7   :  { %v718_v33 = vpop.f32.mrf.mxu0 }
 0x2b8   :  { %v719_v34 = vadd.f32 %v718_v33, %v515_v26  ;;  %v723_v35 = vmax.f32 %v717_v31, 0.0 }
 0x2ba   :  { %v724_v37 = vmax.f32 %v719_v34, 0.0  ;;  %v725_v40 = vpack.c.bf16 %v723_v35, %v721_v38 }
 0x2bc   :  { %v726_v39 = vpack.c.bf16 %v724_v37, %v722_v36 }
 0x2be   :  { %963 = vmatprep.mubr.bf16.mxu1 %v726_v39 }
 0x2bf   :  { %964 = vmatmul.mubr.bf16.vlgmr.msra.gmra.mxu1 %v725_v40 }
 0x37f   :  { %v965_v48 = vpop.f32.mrf.mxu1 }
 0x380   :  { %v966_v55 = vadd.f32 %v965_v48, %v764_v50 }
 0x381   :  { %v967_v51 = vpop.f32.mrf.mxu1 }
 0x382   :  { %v968_v53 = vadd.f32 %v967_v51, %v768_v49  ;;  %v974_v61 = vmax.f32 %v966_v55, 0.0 }
 0x383   :  { %v969_v52 = vpop.f32.mrf.mxu1 }
 0x384   :  { %v970_v54 = vadd.f32 %v969_v52, %v764_v50  ;;  %v975_v59 = vmax.f32 %v968_v53, 0.0 }
 0x385   :  { %v971_v56 = vpop.f32.mrf.mxu1 }
 0x386   :  { %v972_v57 = vadd.f32 %v971_v56, %v768_v49  ;;  %v976_v58 = vmax.f32 %v970_v54, 0.0 }
 0x388   :  { %v977_v60 = vmax.f32 %v972_v57, 0.0  ;;  %v978_v63 = vpack.c.bf16 %v976_v58, %v974_v61 }
 0x38a   :  { %v979_v62 = vpack.c.bf16 %v977_v60, %v975_v59 }
 0x38c   :  { %1147 = vmatprep.mubr.bf16.mxu0 %v979_v62 }
 0x38d   :  { %1148 = vmatmul.mubr.bf16.vlgmr.msra.gmra.mxu0 %v978_v63 }
 0x44d   :  { %v1342_v0 = vpop.f32.mrf.mxu0 }
 0x44f   :  { %v1343_v3 = vpop.f32.mrf.mxu0 }
 0x450   :  { %v1344_v1 = vadd.f32 %v1343_v3, %v1342_v0 }
 0x451   :  { %v1345_v4 = vpop.f32.mrf.mxu0 }
 0x452   :  { %v1150_v5 = vadd.f32 %v1344_v1, %v1309_v2 }
 0x453   :  { %v1346_v6 = vpop.f32.mrf.mxu0 }
 0x454   :  { %v1166_v7 = vrot.slane %v1150_v5, 4  ;;  %1156 = vst [vmem:[#allocation13] sm:$0xff] %v1150_v5  ;;  %v1347_v8 = vadd.f32 %v1346_v6, %v1345_v4 }
 0x456   :  { %v1167_v9 = vadd.f32 %v1166_v7, %v1150_v5  ;;  %v1153_v10 = vadd.f32 %v1347_v8, %v1309_v2 }
 0x458   :  { %1157 = vst [vmem:[#allocation13 + $0x8] sm:$0xff] %v1153_v10  ;;  %v1168_v11 = vrot.slane %v1167_v9, 2 }
 0x459   :  { %1659 = shalt.err (!%p1656_p6)
}
 0x45a   :  { %1184 = dma.vmem_to_hbm [thread:$0]  %s1179_s21, 256, %s1861_s11, [#allocation4], %s1701_s24, %s1701_s24, %s1702_s25   ;;  %v1169_v12 = vadd.f32 %v1168_v11, %v1167_v9 }
 0x45b   :  { %s1712_s23 = smov [#allocation14]  }
 0x45c   :  { %s1191_s26 = sshll.u32 %s1712_s23, 4  ;;  %v1170_v13 = vrot.slane %v1169_v12, 1  ;;  %s1192_s26 = int_to_ptr.vmem [resolvable:$true] %s1191_s26 }
 0x45d   :  { %s1668_s27 = scalar_lea.vmem %s1192_s26, 128  ;;  %p1673_p8 = scmp.lt.s32.totalorder %s1192_s26, %s1192_s26 }
 0x45e   :  { %v1171_v14 = vadd.f32 %v1170_v13, %v1169_v12  ;;  %p1669_p7 = scmp.ne.s32.totalorder %s1192_s26, %s1668_s27  ;;  %p1674_p9 = scmp.lt.s32.totalorder %s1668_s27, %s1668_s27 }
 0x460   :  { %1172 = vst [vmem:[#allocation14] sm:$0xff] %v1171_v14  ;;  %p1675_p10 = por %p1674_p9, %p1673_p8 }
 0x462   :  { %p1676_p11 = pnand %p1675_p10, %p1669_p7 }
 0x464   :  { %1679 = shalt.err (!%p1676_p11)
}
 0x465   :  { %1194 = dma.vmem_to_hbm [thread:$0]  %s1192_s26, 128, %s1862_s12, [#allocation15]  }
 0x466   :  { %1696 = dma.done.wait [#allocation4], 256  }
 0x467   :  { %1697 = vsyncadd [#allocation4], 4294967040 }
 0x468   :  { %1698 = dma.done.wait [#allocation15], 128  }
 0x469   :  { %1699 = vsyncadd [#allocation15], 4294967168 }
 0x46a   :  { %1201 = vsyncpa [#allocation3], 1 }
 0x46b   :  { %1202 = vsyncpa [#allocation6], 1 }
 0x46c   :  { %1203 = vsyncpa [#allocation9], 1 }
 0x46d   :  { %1204 = vsyncpa [#allocation12], 1 }
 0x46e   :  { %1205 = vsyncpa [#allocation4], 1 }
 0x46f   :  { %1206 = vsyncpa [#allocation15], 1 }

</bundles_post_ra>
